<compile_context>
chip_gen: v6e
topology: v6e:2x2x1
jax: 0.10.0
libtpu: 0.0.40
codegen_flags: <defaults>
</compile_context>

<pallas_src>
import math
import jax
import jax.numpy as jnp
from jax.experimental import pallas as pl
from jax.experimental.pallas import tpu as pltpu


_PAD = 128  # zero padding (lanes) on each side of the reduced flat row; needs >= W + 1


def _make_objectness_kernel(H, W, C, Nb):
    HW = H * W

    def kernel(x_ref, w_ref, b_ref, o_ref):
        # x_ref: (Nb, C, HW)  flat feature maps (row-major index y*W + x)
        # w_ref: (9, C)       BN-folded conv weights, tap index = ky*3 + kx
        # b_ref: (1, 1)       BN-folded bias (SMEM scalar)
        # o_ref: (Nb, 1, HW)  sigmoid(conv) output, lane-dense
        w = w_ref[...]                                           # (9, C)
        bias = b_ref[0, 0]

        # Column masks (hoisted out of the batch loop): a dx = -1 tap has no
        # source at x == 0, dx = +1 none at x == W-1.  Row (dy) overflow lands
        # in the zero padding, so no row mask is needed.
        col = jax.lax.broadcasted_iota(jnp.int32, (1, HW), 1) % W
        mask_l = jnp.where(col > 0, 1.0, 0.0)                    # (1, HW)
        mask_r = jnp.where(col < W - 1, 1.0, 0.0)                # (1, HW)
        zpad = jnp.zeros((9, _PAD), jnp.float32)

        for n in range(Nb):                                      # static tiny loop
            x = x_ref[n]                                         # (C, HW)
            # Channel contraction first on the MXU (shift and channel-sum
            # commute, so the result is identical to per-tap accumulation).
            y = jnp.dot(w, x, preferred_element_type=jnp.float32,
                        precision=jax.lax.Precision.HIGHEST)     # (9, HW)
            yp = jnp.concatenate([zpad, y, zpad], axis=1)        # (9, HW + 2*_PAD)

            # Shift the channel-reduced rows; group taps by dx so each column
            # mask is applied once instead of per-tap.
            acc_dx = []
            for dx in (-1, 0, 1):
                acc = jnp.zeros((1, HW), jnp.float32)
                for dy in (-1, 0, 1):
                    tap = (dy + 1) * 3 + (dx + 1)
                    s = dy * W + dx
                    acc = acc + yp[tap:tap + 1, _PAD + s:_PAD + s + HW]
                acc_dx.append(acc)

            conv = acc_dx[0] * mask_l + acc_dx[1] + acc_dx[2] * mask_r + bias
            o_ref[n] = jax.nn.sigmoid(conv)                      # (1, HW) store

    return kernel


def fold_batchnorm(conv_w, conv_b, gamma, beta, running_mean, running_var, eps=1e-5):
    """Fold eval-mode BatchNorm2d(1) into Conv2d(C, 1, 3) weights/bias."""
    scale = gamma / jnp.sqrt(running_var + eps)                   # (1,)
    w = conv_w * scale.reshape(-1, 1, 1, 1)                       # (1, C, 3, 3)
    b = (conv_b - running_mean) * scale + beta                    # (1,)
    return w, b


def objectness_head_forward(feature, params):
    """ObjectnessHead.forward.  feature: (N, C, H, W) -> p: (N, 1, H, W) f32."""
    N, C, H, W = feature.shape
    HW = H * W
    # TODO(synk): W >= 128 would require tiling HW into lane-multiple chunks
    # with a +/-(W+1)-lane halo; single-block-per-image layout is used here.
    assert W + 1 <= _PAD
    # TODO(synk): training-mode BatchNorm (batch statistics) is not implemented;
    # eval-mode running stats are folded into the conv.
    w_f, b_f = fold_batchnorm(params["conv_w"], params["conv_b"], params["bn_gamma"],
                              params["bn_beta"], params["bn_mean"], params["bn_var"])
    x_flat = feature.reshape(N, C, HW).astype(jnp.float32)        # pure reshape, stays NCHW
    # (1, C, 3, 3) -> (9, C), tap index ky*3 + kx  (lane-dense, feeds the MXU dot)
    w_taps = jnp.transpose(w_f[0], (1, 2, 0)).reshape(9, C).astype(jnp.float32)
    b_smem = b_f.reshape(1, 1).astype(jnp.float32)

    # Grid: keep >= 2 parallel steps when the batch allows it (uses both v7x
    # TensorCores); on single-TC v5e/v6e this costs at most one extra grid step.
    Nb = N // 2 if (N >= 2 and N % 2 == 0) else N
    grid = (N // Nb,)

    p_flat = pl.pallas_call(
        _make_objectness_kernel(H, W, C, Nb),
        out_shape=jax.ShapeDtypeStruct((N, 1, HW), jnp.float32),
        grid=grid,
        in_specs=[
            pl.BlockSpec((Nb, C, HW), lambda n: (n, 0, 0)),
            pl.BlockSpec((9, C), lambda n: (0, 0)),
            pl.BlockSpec((1, 1), lambda n: (0, 0),
                         memory_space=pltpu.MemorySpace.SMEM),
        ],
        out_specs=pl.BlockSpec((Nb, 1, HW), lambda n: (n, 0, 0)),
        compiler_params=pltpu.CompilerParams(dimension_semantics=("parallel",)),
    )(x_flat, w_taps, b_smem)
    return p_flat.reshape(N, 1, H, W)


def objectness_head_get_xy(p, k):
    """Mirror of ObjectnessHead.get_xy.  p: (N, 1, H, W) or (N, H, W)."""
    if p.ndim == 4:
        p = p[:, 0]
    N, H, W = p.shape
    p_flat = p.reshape(N, -1)
    # TODO(synk): top-k has no clean Pallas TPU primitive; stays in plain JAX.
    _, indices = jax.lax.top_k(p_flat, k)
    xy = jnp.stack(((indices // W).astype(jnp.float32) / float(H),
                    (indices % W).astype(jnp.float32) / float(W)), axis=-1)
    return xy, indices


def init_params(key, C):
    """Deterministic synthetic params matching ObjectnessHead's PyTorch layers."""
    kw, kb = jax.random.split(key)
    bound = 1.0 / math.sqrt(C * 9)
    return {
        "conv_w": jax.random.uniform(kw, (1, C, 3, 3), jnp.float32, -bound, bound),
        "conv_b": jax.random.uniform(kb, (1,), jnp.float32, -bound, bound),
        "bn_gamma": jnp.ones((1,), jnp.float32),
        "bn_beta": jnp.zeros((1,), jnp.float32),
        "bn_mean": jnp.zeros((1,), jnp.float32),
        "bn_var": jnp.ones((1,), jnp.float32),
    }


if __name__ == "__main__":
    N, C, H, W, K = 2, 32, 16, 16, 8
    key = jax.random.PRNGKey(0)
    k_x, k_p = jax.random.split(key)
    x = jax.random.normal(k_x, (N, C, H, W), jnp.float32)
    params = init_params(k_p, C)

    p = objectness_head_forward(x, params)
    xy, indices = objectness_head_get_xy(p, K)
    jax.block_until_ready((p, xy, indices))

    # shape checks (PyTorch conventions)
    assert p.shape == (N, 1, H, W)
    assert xy.shape == (N, K, 2)
    assert indices.shape == (N, K)

    # numerical check against a pure-JAX reference of the same forward pass
    w_f, b_f = fold_batchnorm(params["conv_w"], params["conv_b"], params["bn_gamma"],
                              params["bn_beta"], params["bn_mean"], params["bn_var"])
    ref = jax.nn.sigmoid(
        jax.lax.conv_general_dilated(
            x, w_f, window_strides=(1, 1), padding="SAME",
            dimension_numbers=("NCHW", "OIHW", "NCHW"),
            precision=jax.lax.Precision.HIGHEST) + b_f[0])
    max_err = float(jnp.max(jnp.abs(p - ref)))
    assert max_err < 1e-4, f"kernel/reference mismatch: max abs err = {max_err}"
    print("KERNEL_OK")
</pallas_src>

<mosaic_0001>
module attributes {stable_mosaic.version = 11 : i64} {
  func.func @kernel(%arg0: i32, %arg1: memref<1x32x256xf32, #tpu.memory_space<vmem>>, %arg2: memref<9x32xf32, #tpu.memory_space<vmem>>, %arg3: memref<1x1xf32, #tpu.memory_space<smem>>, %arg4: memref<1x1x256xf32, #tpu.memory_space<vmem>>) attributes {dimension_semantics = [#tpu.dimension_semantics<parallel>], iteration_bounds = array<i64: 2>, scalar_prefetch = 0 : i64, scratch_operands = 0 : i64, tpu.core_type = #tpu.core_type<tc>, window_params = [{transform_indices = @transform_0, window_bounds = array<i64: 1, 32, 256>}, {pipeline_mode = #tpu.pipeline_mode<synchronous>, transform_indices = @transform_1, window_bounds = array<i64: 9, 32>}, {transform_indices = @transform_2, window_bounds = array<i64: 1, 1>}, {transform_indices = @transform_3, window_bounds = array<i64: 1, 1, 256>}]} {
    %c0 = arith.constant 0 : index
    %c0_0 = arith.constant 0 : index
    %0 = vector.load %arg2[%c0, %c0_0] : memref<9x32xf32, #tpu.memory_space<vmem>>, vector<9x32xf32>
    %c0_1 = arith.constant 0 : index
    %c0_2 = arith.constant 0 : index
    %1 = memref.load %arg3[%c0_1, %c0_2] : memref<1x1xf32, #tpu.memory_space<smem>>
    %2 = tpu.iota {dimensions = array<i32: 1>} : vector<1x256xi32>
    %c16_i32 = arith.constant 16 : i32
    %c0_i32 = arith.constant 0 : i32
    %3 = arith.cmpi eq, %c16_i32, %c0_i32 : i32
    %c1_i32 = arith.constant 1 : i32
    %4 = arith.select %3, %c1_i32, %c16_i32 : i32
    %5 = vector.broadcast %4 : i32 to vector<1x256xi32>
    %6 = arith.remsi %2, %5 : vector<1x256xi32>
    %c0_i32_3 = arith.constant 0 : i32
    %7 = vector.broadcast %c0_i32_3 : i32 to vector<1x256xi32>
    %8 = arith.cmpi ne, %6, %7 : vector<1x256xi32>
    %c0_i32_4 = arith.constant 0 : i32
    %9 = vector.broadcast %c0_i32_4 : i32 to vector<1x256xi32>
    %10 = arith.cmpi slt, %6, %9 : vector<1x256xi32>
    %c0_i32_5 = arith.constant 0 : i32
    %11 = arith.cmpi slt, %4, %c0_i32_5 : i32
    %12 = vector.broadcast %11 : i1 to vector<1x256xi1>
    %13 = vector.broadcast %12 : vector<1x256xi1> to vector<1x256xi1>
    %14 = arith.xori %10, %13 : vector<1x256xi1>
    %15 = arith.andi %14, %8 : vector<1x256xi1>
    %16 = vector.broadcast %4 : i32 to vector<1x256xi32>
    %17 = arith.addi %6, %16 : vector<1x256xi32>
    %18 = arith.select %15, %17, %6 : vector<1x256xi1>, vector<1x256xi32>
    %c0_i32_6 = arith.constant 0 : i32
    %19 = vector.broadcast %c0_i32_6 : i32 to vector<1x256xi32>
    %20 = arith.cmpi sgt, %18, %19 : vector<1x256xi32>
    %cst = arith.constant 1.000000e+00 : f32
    %cst_7 = arith.constant 0.000000e+00 : f32
    %21 = vector.broadcast %cst : f32 to vector<1x256xf32>
    %22 = vector.broadcast %cst_7 : f32 to vector<1x256xf32>
    %23 = arith.select %20, %21, %22 : vector<1x256xi1>, vector<1x256xf32>
    %c15_i32 = arith.constant 15 : i32
    %24 = vector.broadcast %c15_i32 : i32 to vector<1x256xi32>
    %25 = arith.cmpi slt, %18, %24 : vector<1x256xi32>
    %cst_8 = arith.constant 1.000000e+00 : f32
    %cst_9 = arith.constant 0.000000e+00 : f32
    %26 = vector.broadcast %cst_8 : f32 to vector<1x256xf32>
    %27 = vector.broadcast %cst_9 : f32 to vector<1x256xf32>
    %28 = arith.select %25, %26, %27 : vector<1x256xi1>, vector<1x256xf32>
    %cst_10 = arith.constant 0.000000e+00 : f32
    %29 = vector.broadcast %cst_10 : f32 to vector<9x128xf32>
    %c0_11 = arith.constant 0 : index
    %c0_12 = arith.constant 0 : index
    %c0_13 = arith.constant 0 : index
    %30 = vector.load %arg1[%c0_11, %c0_12, %c0_13] : memref<1x32x256xf32, #tpu.memory_space<vmem>>, vector<1x32x256xf32>
    %31 = vector.shape_cast %30 : vector<1x32x256xf32> to vector<32x256xf32>
    %cst_14 = arith.constant dense<0.000000e+00> : vector<9x256xf32>
    %32 = tpu.matmul %0, %31, %cst_14 {dimension_numbers = #tpu.dot_dimension_numbers<[1], [0], [0], [1], [0, 0, 1, 1], [], []>, precision = #tpu.contract_precision<fp32>} : vector<9x32xf32>, vector<32x256xf32>, vector<9x256xf32> -> vector<9x256xf32>
    %33 = tpu.concatenate %29, %32, %29 in 1 : vector<9x128xf32>, vector<9x256xf32>, vector<9x128xf32> -> vector<9x512xf32>
    %cst_15 = arith.constant 0.000000e+00 : f32
    %34 = vector.broadcast %cst_15 : f32 to vector<1x256xf32>
    %35 = vector.extract_strided_slice %33 {offsets = [0, 111], sizes = [1, 256], strides = [1, 1]} : vector<9x512xf32> to vector<1x256xf32>
    %36 = arith.addf %34, %35 : vector<1x256xf32>
    %37 = vector.extract_strided_slice %33 {offsets = [3, 127], sizes = [1, 256], strides = [1, 1]} : vector<9x512xf32> to vector<1x256xf32>
    %38 = arith.addf %36, %37 : vector<1x256xf32>
    %39 = vector.extract_strided_slice %33 {offsets = [6, 143], sizes = [1, 256], strides = [1, 1]} : vector<9x512xf32> to vector<1x256xf32>
    %40 = arith.addf %38, %39 : vector<1x256xf32>
    %cst_16 = arith.constant 0.000000e+00 : f32
    %41 = vector.broadcast %cst_16 : f32 to vector<1x256xf32>
    %42 = vector.extract_strided_slice %33 {offsets = [1, 112], sizes = [1, 256], strides = [1, 1]} : vector<9x512xf32> to vector<1x256xf32>
    %43 = arith.addf %41, %42 : vector<1x256xf32>
    %44 = vector.extract_strided_slice %33 {offsets = [4, 128], sizes = [1, 256], strides = [1, 1]} : vector<9x512xf32> to vector<1x256xf32>
    %45 = arith.addf %43, %44 : vector<1x256xf32>
    %46 = vector.extract_strided_slice %33 {offsets = [7, 144], sizes = [1, 256], strides = [1, 1]} : vector<9x512xf32> to vector<1x256xf32>
    %47 = arith.addf %45, %46 : vector<1x256xf32>
    %cst_17 = arith.constant 0.000000e+00 : f32
    %48 = vector.broadcast %cst_17 : f32 to vector<1x256xf32>
    %49 = vector.extract_strided_slice %33 {offsets = [2, 113], sizes = [1, 256], strides = [1, 1]} : vector<9x512xf32> to vector<1x256xf32>
    %50 = arith.addf %48, %49 : vector<1x256xf32>
    %51 = vector.extract_strided_slice %33 {offsets = [5, 129], sizes = [1, 256], strides = [1, 1]} : vector<9x512xf32> to vector<1x256xf32>
    %52 = arith.addf %50, %51 : vector<1x256xf32>
    %53 = vector.extract_strided_slice %33 {offsets = [8, 145], sizes = [1, 256], strides = [1, 1]} : vector<9x512xf32> to vector<1x256xf32>
    %54 = arith.addf %52, %53 : vector<1x256xf32>
    %55 = arith.mulf %40, %23 : vector<1x256xf32>
    %56 = arith.addf %55, %47 : vector<1x256xf32>
    %57 = arith.mulf %54, %28 : vector<1x256xf32>
    %58 = arith.addf %56, %57 : vector<1x256xf32>
    %59 = vector.broadcast %1 : f32 to vector<1x256xf32>
    %60 = arith.addf %58, %59 : vector<1x256xf32>
    %61 = arith.negf %60 : vector<1x256xf32>
    %62 = math.exp %61 : vector<1x256xf32>
    %cst_18 = arith.constant 1.000000e+00 : f32
    %63 = vector.broadcast %cst_18 : f32 to vector<1x256xf32>
    %64 = arith.addf %63, %62 : vector<1x256xf32>
    %65 = arith.divf %63, %64 : vector<1x256xf32>
    %c0_19 = arith.constant 0 : index
    %c0_20 = arith.constant 0 : index
    %c0_21 = arith.constant 0 : index
    %66 = vector.load %arg4[%c0_19, %c0_20, %c0_21] : memref<1x1x256xf32, #tpu.memory_space<vmem>>, vector<1x1x256xf32>
    %67 = vector.shape_cast %66 : vector<1x1x256xf32> to vector<1x256xf32>
    %68 = vector.shape_cast %65 : vector<1x256xf32> to vector<1x1x256xf32>
    tpu.vector_store %arg4[%c0_19, %c0_20, %c0_21], %68 {strides = array<i32>} : memref<1x1x256xf32, #tpu.memory_space<vmem>>, vector<1x1x256xf32>,
    return
  }
  func.func @transform_0(%arg0: i32) -> (i32, i32, i32) {
    %c0_i32 = arith.constant 0 : i32
    %c0_i32_0 = arith.constant 0 : i32
    %c0_i32_1 = arith.constant 0 : i32
    return %arg0, %c0_i32, %c0_i32_0 : i32, i32, i32
  }
  func.func @transform_1(%arg0: i32) -> (i32, i32) {
    %c0_i32 = arith.constant 0 : i32
    %c0_i32_0 = arith.constant 0 : i32
    %c0_i32_1 = arith.constant 0 : i32
    return %c0_i32, %c0_i32_0 : i32, i32
  }
  func.func @transform_2(%arg0: i32) -> (i32, i32) {
    %c0_i32 = arith.constant 0 : i32
    %c0_i32_0 = arith.constant 0 : i32
    %c0_i32_1 = arith.constant 0 : i32
    return %c0_i32, %c0_i32_0 : i32, i32
  }
  func.func @transform_3(%arg0: i32) -> (i32, i32, i32) {
    %c0_i32 = arith.constant 0 : i32
    %c0_i32_0 = arith.constant 0 : i32
    %c0_i32_1 = arith.constant 0 : i32
    return %arg0, %c0_i32, %c0_i32_0 : i32, i32, i32
  }
}

</mosaic_0001>

<bundles_post_ra>
// kernel: tpu_custom_call.1
= control target key start
LH: loop header
LB: loop body
LE: loop exit
PB: predicated region body
PF: predicated region fallthrough
CT: control target
= control target key end

     0   :  { %s1751_s0 = inlined_call_operand.hbm [shape: f32[2,32,256], index: 0, kind: input, shape index: {}]   ;;  %s1752_s1 = inlined_call_operand.hbm [shape: f32[9,32], index: 1, kind: input, shape index: {}]   ;;  %s1753_s2 = inlined_call_operand.<no memory space> [shape: f32[1,1], index: 2, kind: input, shape index: {}]   ;;  %s1754_s3 = inlined_call_operand.hbm [shape: f32[2,1,256], index: 3, kind: output, shape index: {}]  }
   0x1   :  { %8 = sst [smem:[#allocation2]] %s1753_s2 }
   0x2   :  { %9 = vsyncpa [#allocation4], 0 }
   0x3   :  { %11 = vsyncpa [#allocation4 + $0x1], 0 }
   0x4   :  { %12 = vsyncpa [#allocation7], 0 }
   0x5   :  { %13 = vsyncpa [#allocation5], 0 }
   0x6   :  { %15 = vsyncpa [#allocation5 + $0x1], 0  ;;  %s1413_s14 = smov 0   ;;  %s1415_s15 = smov 0  }
   0x7   :  { %s1417_s16 = smov 0   ;;  %s1419_s17 = smov 0  }
   0x8 LB: > { %s1434_s2 = sadd.s32 4294967295, %s1372_s17   ;;  %s1137_s18 = sadd.s32 4294967294, %s1372_s17   ;;  %s1372_s17 = sphi %s1419_s17, %s1776_s17   ;;  %s1368_s16 = sphi %s1417_s16, %s1775_s16   ;;  %s1364_s15 = sphi %s1415_s15, %s1774_s15   ;;  %s1360_s14 = sphi %s1413_s14, %s1773_s14  }
   0x9   : > { %p41_p0 = scmp.ne.s32.totalorder %s1364_s15, %s1360_s14  ;;  %p1755_p1 = scmp.eq.s32.totalorder %s1434_s2, 0 }
   0xa   : > { %p113_p3 = scmp.eq.s32.totalorder %s1137_s18, 1  ;;  %p1138_p5 = scmp.ge.s32.totalorder %s1372_s17, 1 }
   0xb   : > { %p1443_p4 = por %p1755_p1, %p41_p0  ;;  %p120_p7 = scmp.lt.s32.totalorder %s1372_s17, 3 }
   0xc   : > { %p1448_p6 = por %p113_p3, %p41_p0  ;;  %s1374_s22 = smov [#allocation6]  }
   0xd   : > { %s1759_s19 = scalar_select %p1443_p4, 1, 0 }
   0xe   : > { %s1760_s20 = scalar_select %p1448_p6, 1, 0 }
   0xf   : > { %p1453_p8 = pnand %p1138_p5, %p120_p7  ;;  %s132_s23 = sshll.u32 %s1374_s22, 4  ;;  %s133_s23 = int_to_ptr.vmem [resolvable:$true] %s132_s23 }
  0x10   : > { %s1467_s25 = sadd.s32 1, %s1372_s17   ;;  %s28_s26 = sadd.s32 1, %s1368_s16 }
  0x11   : > { %s1761_s21 = scalar_select %p1453_p8, 1, 0 }
  0x12   : > { %p1166_p9 = pneg %p1453_p8  ;;  %s25_s27 = ssub.s32 %s1372_s17, %s1467_s25 }
  0x13   : > { %s1261_s28 = scalar_lea.vmem %s133_s23, 256  ;;  %p1269_p5 = scmp.lt.s32.totalorder %s133_s23, %s133_s23 }
  0x14   : > { %p1462_p11 = pnand %p1166_p9, %p1755_p1  ;;  %p1262_p13 = scmp.ne.s32.totalorder %s133_s23, %s1261_s28 }
  0x15   : > { %p1270_p7 = scmp.lt.s32.totalorder %s1261_s28, %s1261_s28 }
  0x16   : > { %p1252_p12 = pneg %p1462_p11 }
  0x17   : > { %p1271_p10 = por %p1270_p7, %p1269_p5 }
  0x18   : > { %p1264_p0 = pnand %p1262_p13, %p1252_p12 }
  0x1a   : > { %p1265_p3 = pneg %p1264_p0 }
  0x1c   : > { %p1272_p2 = pnand %p1271_p10, %p1265_p3 }
  0x1e   : > { %1275 = shalt.err (!%p1272_p2)
}
  0x1f   : > { %s1375_s29 = smov 128   ;;  %s1376_s30 = smov 8  }
  0x20   : > { %1169 = dma.hbm_to_vmem [thread:$0]  (!%p1462_p11), %s1752_s1, 256, %s133_s23, [#allocation7], %s1375_s29, %s1375_s29, %s1376_s30  }
  0x21   : > { %p26_p9 = scmp.eq.s32.totalorder %s25_s27, 0  ;;  %p35_p12 = scmp.ne.s32.totalorder %s1368_s16, %s1364_s15 }
  0x22   : > { %p36_p10 = scmp.eq.s32.totalorder %s1372_s17, 0  ;;  %p1179_p2 = scmp.lt.s32.totalorder %s1372_s17, 2 }
  0x23   : > { %s1484_s6 = scalar_select %p26_p9, %s1368_s16, %s28_s26  }
  0x24   : > { %p37_p13 = por %p36_p10, %p35_p12  ;;  %p1763_p0 = scmp.eq.s32.totalorder %s1434_s2, 1 }
  0x25   : > { %s149_s8 = sand.u32 1, %s1368_s16   ;;  %s1156_s9 = sshll.u32 %s1372_s17, 10 }
  0x26   : > { %p1488_p3 = por %p1763_p0, %p35_p12  ;;  %s1141_s10 = sshll.u32 %s149_s8, 6 }
  0x27   : > { %s1497_s13 = scalar_lea.hbm %s1751_s0, %s1156_s9  ;;  %s153_s18 = scalar_lea.vmem [#allocation3], %s1141_s10 }
  0x28   : > { %s1764_s7 = scalar_select %p1488_p3, 1, 0 }
  0x29   : > { %s160_s22 = sshll.u32 %s153_s18, 4  ;;  %p1499_p11 = pnand %p1179_p2, %p37_p13  ;;  %s1503_s22 = int_to_ptr.vmem [resolvable:$true] %s160_s22 }
  0x2a   : > { %s1505_s24 = scalar_lea.sflag [#allocation4], %s149_s8  ;;  %s1276_s26 = scalar_lea.hbm %s1497_s13, 1024 }
  0x2b   : > { %p1277_p5 = scmp.ne.s32.totalorder %s1497_s13, %s1276_s26  ;;  %p1278_p7 = pneg %p1499_p11 }
  0x2c   : > { %s1281_s29 = scalar_lea.hbm %s1751_s0, 2048  ;;  %p1282_p10 = scmp.lt.s32.totalorder %s1497_s13, %s1751_s0 }
  0x2d   : > { %p1279_p9 = pnand %p1278_p7, %p1277_p5  ;;  %p1283_p2 = scmp.lt.s32.totalorder %s1281_s29, %s1276_s26 }
  0x2f   : > { %p1280_p12 = pneg %p1279_p9  ;;  %p1284_p13 = por %p1283_p2, %p1282_p10 }
  0x31   : > { %p1285_p0 = pnand %p1284_p13, %p1280_p12 }
  0x33   : > { %1288 = shalt.err (!%p1285_p0)
}
  0x34   : > { %s1289_s5 = scalar_lea.vmem %s1503_s22, 1024  ;;  %s1377_s8 = smov [#allocation3]  }
  0x35   : > { %p1290_p1 = scmp.ne.s32.totalorder %s1503_s22, %s1289_s5  ;;  %s1294_s9 = sshll.u32 %s1377_s8, 4  ;;  %s1295_s9 = int_to_ptr.vmem [resolvable:$false] %s1294_s9 }
  0x36   : > { %s1296_s10 = scalar_lea.vmem %s1295_s9, 2048  ;;  %p1297_p9 = scmp.lt.s32.totalorder %s1503_s22, %s1295_s9 }
  0x37   : > { %p1292_p6 = pnand %p1290_p1, %p1278_p7  ;;  %p1298_p3 = scmp.lt.s32.totalorder %s1296_s10, %s1289_s5 }
  0x39   : > { %p1293_p5 = pneg %p1292_p6  ;;  %p1299_p4 = por %p1298_p3, %p1297_p9 }
  0x3b   : > { %p1300_p8 = pnand %p1299_p4, %p1293_p5 }
  0x3d   : > { %1303 = shalt.err (!%p1300_p8)
}
  0x3e   : > { %s1378_s11 = smov 256   ;;  %s1379_s12 = smov 16  }
  0x3f   : > { %1173 = dma.hbm_to_vmem [thread:$0]  (!%p1499_p11), %s1497_s13, 1024, %s1503_s22, %s1505_s24, %s1378_s11, %s1378_s11, %s1379_s12  }
  0x40   : > { %p1766_p1 = scmp.ne.s32.totalorder %s1761_s21, 0 }
  0x41   : > { %s1529_s18 = sand.u32 (!%p1766_p1), 1, %s1364_s15   ;;  %p1767_p4 = scmp.ne.s32.totalorder (!%p1766_p1), %s1759_s19, 0 }
  0x42   : > { %172 = sbr.rel (%p1766_p1) target bundleno = 744 (0x2e8), region = 32  ;;  %s1145_s26 = sshll.u32 (!%p1766_p1), %s1529_s18, 6 }
  0x43   : > { %s175_s27 = scalar_lea.sflag (!%p1766_p1), [#allocation4], %s1529_s18  ;;  %s178_s28 = scalar_lea.vmem (!%p1766_p1), [#allocation3], %s1145_s26 }
  0x47   : > { %1347 = dma.done.wait (%p1767_p4), %s175_s27, 1024  }
  0x48   : > { %1349 = vsyncadd (%p1767_p4), %s175_s27, 4294966272  ;;  %p1768_p6 = scmp.eq.s32.totalorder %s1434_s2, 0 }
  0x4a   : > { %1351 = dma.done.wait (%p1768_p6), [#allocation7], 256   ;;  %p1769_p8 = pmov %p1768_p6 }
  0x4b   : > { %v1380_v0 = vmov 0.0   ;;  %v250_v1 = vld [vmem:[%s178_s28 + $0x38] sm:$0xff]  ;;  %v249_v2 = vld [vmem:[%s178_s28 + $0x30] sm:$0xff]  ;;  %v248_v3 = vld [vmem:[%s178_s28 + $0x28] sm:$0xff]  ;;  %vm251_vm0 = vcmask 261120   ;;  %s1381_s19 = smov 96  }
  0x4c   : > { %1353 = vsyncadd (%p1769_p8), [#allocation7], 4294967040  ;;  %330 = vmatprep.mubr.f32.mxu0 %v1380_v0  ;;  %457 = vmatprep.mubr.f32.mxu1 %v1380_v0  ;;  %v1543_v4 = vand.u32 4294901760, %v250_v1  ;;  %v1545_v5 = vand.u32 4294901760, %v249_v2  ;;  %v1547_v6 = vand.u32 4294901760, %v248_v3  ;;  %v247_v7 = vld [vmem:[%s178_s28 + $0x20] sm:$0xff] }
  0x4d   : > { %v246_v8 = vld [vmem:[%s178_s28 + $0x18] sm:$0xff]  ;;  %v245_v9 = vld [vmem:[%s178_s28 + $0x10] sm:$0xff]  ;;  %v1549_v10 = vand.u32 4294901760, %v247_v7  ;;  %v244_v13 = vld [vmem:[%s178_s28 + $0x8] sm:$0xff]  ;;  %v875_v63 = vrot.slane %v1380_v0, 6  ;;  %s1382_s21 = smov 112  }
  0x4e   : > { %v1551_v11 = vand.u32 4294901760, %v246_v8  ;;  %v1553_v12 = vand.u32 4294901760, %v245_v9  ;;  %v243_v14 = vld [vmem:[%s178_s28] sm:$0xff]  ;;  %283 = vmatprep.subr.mxu0 %v1543_v4  ;;  %v1556_v16 = vand.u32 4294901760, %v244_v13  ;;  %v1559_v17 = vsub.f32 %v250_v1, %v1543_v4  ;;  %v206_v20 = vld [vmem:[#allocation6 + $0x8] sm:$0x1] }
  0x4f   : > { %v205_v15 = vld [vmem:[#allocation6] sm:$0xff]  ;;  %v1561_v18 = vand.u32 4294901760, %v243_v14  ;;  %v1564_v19 = vsub.f32 %v249_v2, %v1545_v5  ;;  %285 = vmatpush1.msra.mxu0 %v1545_v5  ;;  %v1569_v22 = vsub.f32 %v248_v3, %v1547_v6  ;;  %v1572_v23 = vsub.f32 %v247_v7, %v1549_v10  ;;  %880 = vrot.lane.b32.xlu1 %v875_v63, %s1381_s19  ;;  %s1383_s13 = smov 113   ;;  %s1384_s22 = smov 111  }
  0x50   : > { %v253_v21 = vsel %vm251_vm0, %v205_v15, 0  ;;  %v1575_v24 = vsub.f32 %v246_v8, %v1551_v11  ;;  %287 = vmatprep.subr.mxu0 %v1547_v6  ;;  %v379_v25 = vand.u32 4294901760, %v1559_v17  ;;  %v1583_v28 = vsub.f32 %v245_v9, %v1553_v12  ;;  %s1385_s23 = smov 127   ;;  %s1386_s24 = smov 126  }
  0x51   : > { %v385_v26 = vand.u32 4294901760, %v1564_v19  ;;  %v1580_v27 = vand.u32 4294901760, %v253_v21  ;;  %289 = vmatpush1.msra.mxu0 %v1549_v10  ;;  %v391_v29 = vand.u32 4294901760, %v1569_v22  ;;  %v397_v30 = vand.u32 4294901760, %v1572_v23  ;;  %s207_s29 = sld [smem:[#allocation2]]  ;;  %s1388_s30 = smov 17  }
  0x52   : > { %v403_v31 = vand.u32 4294901760, %v1575_v24  ;;  %v256_v32 = vsel %vm251_vm0, %v206_v20, 0  ;;  %291 = vmatprep.subr.mxu0 %v1551_v11  ;;  %v380_v33 = vsub.f32 %v1559_v17, %v379_v25  ;;  %v409_v36 = vand.u32 4294901760, %v1583_v28  ;;  %s1147_s4 = sshll.u32 %s1529_s18, 1  ;;  %s1157_s5 = sshll.u32 %s1434_s2, 5 }
  0x53   : > { %v386_v34 = vsub.f32 %v1564_v19, %v385_v26  ;;  %v1598_v35 = vsub.f32 %v253_v21, %v1580_v27  ;;  %293 = vmatpush1.msra.mxu0 %v1553_v12  ;;  %v392_v37 = vsub.f32 %v1569_v22, %v391_v29  ;;  %v398_v38 = vsub.f32 %v1572_v23, %v397_v30  ;;  %s204_s8 = scalar_lea.vmem [#allocation8], %s1147_s4  ;;  %s1714_s12 = scalar_lea.hbm %s1754_s3, %s1157_s5 }
  0x54   : > { %v404_v39 = vsub.f32 %v1575_v24, %v403_v31  ;;  %v1611_v40 = vand.u32 4294901760, %v256_v32  ;;  %295 = vmatprep.subr.mxu0 %v1556_v16  ;;  %v381_v41 = vand.u32 4294901760, %v380_v33  ;;  %v410_v44 = vsub.f32 %v1583_v28, %v409_v36  ;;  %s1057_s9 = sshll.u32 %s204_s8, 4  ;;  %s1043_s26 = scalar_lea.sflag [#allocation5], %s1529_s18  ;;  %s1058_s9 = int_to_ptr.vmem [resolvable:$true] %s1057_s9 }
  0x55   : > { %v387_v42 = vand.u32 4294901760, %v386_v34  ;;  %v333_v43 = vand.u32 4294901760, %v1598_v35  ;;  %297 = vmatpush1.msra.mxu0 %v1561_v18  ;;  %v393_v45 = vand.u32 4294901760, %v392_v37  ;;  %v399_v46 = vand.u32 4294901760, %v398_v38  ;;  %s1304_s27 = scalar_lea.vmem %s1058_s9, 32  ;;  %p1770_p11 = scmp.ne.s32.totalorder %s1764_s7, 0 }
  0x56   : > { %v1620_v47 = vsub.f32 %v256_v32, %v1611_v40  ;;  %382 = vmatprep.subr.mxu1 %v381_v41  ;;  %498 = vmatprep.subr.mxu0 %v1559_v17  ;;  %v405_v49 = vand.u32 4294901760, %v404_v39  ;;  %v414_v50 = vsub.f32 %v244_v13, %v1556_v16  ;;  %v420_v51 = vsub.f32 %v243_v14, %v1561_v18  ;;  %p1305_p3 = scmp.ne.s32.totalorder %s1058_s9, %s1304_s27  ;;  %s1389_s2 = smov [#allocation8]  }
  0x57   : > { %v334_v48 = vsub.f32 %v1598_v35, %v333_v43  ;;  %388 = vmatpush1.msra.mxu1 %v387_v42  ;;  %v411_v54 = vand.u32 4294901760, %v410_v44  ;;  %v855_v1 = vrot.slane %v1380_v0, 3  ;;  %vm864_vm5 = vcmask 916480   ;;  %s1308_s28 = sshll.u32 %s1389_s2, 4  ;;  %s1309_s28 = int_to_ptr.vmem [resolvable:$false] %s1308_s28 }
  0x58   : > { %v344_v52 = vand.u32 4294901760, %v1620_v47  ;;  %394 = vmatprep.subr.mxu1 %v393_v45  ;;  %v415_v55 = vand.u32 4294901760, %v414_v50  ;;  %v421_v56 = vand.u32 4294901760, %v420_v51  ;;  %vm882_vm6 = vcmask 785408   ;;  %p1306_p7 = pnand %p1305_p3, %p1770_p11  ;;  %p1311_p10 = scmp.lt.s32.totalorder %s1058_s9, %s1309_s28 }
  0x59   : > { %v335_v53 = vand.u32 4294901760, %v334_v48  ;;  %400 = vmatpush1.msra.mxu1 %v399_v46  ;;  %858 = vrot.lane.b32.xlu0 %v855_v1, %s1382_s21  ;;  %vm954_vm7 = vcmask 924672   ;;  %vm939_vm8 = vcmask 1039360   ;;  %vm919_vm9 = vcmask 908288  }
  0x5a   : > { %v345_v57 = vsub.f32 %v1620_v47, %v344_v52  ;;  %406 = vmatprep.subr.mxu1 %v405_v49  ;;  %v416_v58 = vsub.f32 %v414_v50, %v415_v55  ;;  %v422_v59 = vsub.f32 %v420_v51, %v421_v56  ;;  %vm974_vm10 = vcmask 1031168   ;;  %p1307_p12 = pneg %p1306_p7 }
  0x5b   : > { %336 = vmatmul.mubr.f32.vlgmr.msra.gmra.mxu0 %v335_v53  ;;  %412 = vmatpush1.msra.mxu1 %v411_v54  ;;  %vm1034_vm11 = vcmask 138240  }
  0x5c   : > { %501 = vmatpush1.msra.mxu0 %v1564_v19  ;;  %341 = vmatprep.mubr.f32.mxu0 %v1380_v0  ;;  %v346_v60 = vand.u32 4294901760, %v345_v57  ;;  %v417_v61 = vand.u32 4294901760, %v416_v58  ;;  %v423_v62 = vand.u32 4294901760, %v422_v59 }
  0x5d   : > { %504 = vmatprep.subr.mxu0 %v1569_v22 }
  0x5e   : > { %507 = vmatpush1.msra.mxu0 %v1572_v23  ;;  %418 = vmatprep.subr.mxu1 %v417_v61 }
  0x5f   : > { %347 = vmatmul.mubr.f32.gmra.mxu0 %v346_v60  ;;  %510 = vmatprep.subr.mxu0 %v1575_v24 }
  0x60   : > { %424 = vmatpush1.msra.mxu1 %v423_v62  ;;  %513 = vmatpush1.msra.mxu0 %v1583_v28 }
  0x61   : > { %459 = vmatmul.mubr.f32.vlgmr.msra.gmra.mxu1 %v1580_v27  ;;  %516 = vmatprep.subr.mxu0 %v414_v50 }
  0x62   : > { %594 = vmatprep.subr.mxu1 %v1543_v4  ;;  %519 = vmatpush1.msra.mxu0 %v420_v51 }
  0x63   : > { %552 = vmatprep.mubr.f32.mxu0 %v1380_v0  ;;  %596 = vmatpush1.msra.mxu1 %v1545_v5 }
  0x64   : > { %555 = vmatmul.mubr.f32.vlgmr.msra.gmra.mxu0 %v1598_v35  ;;  %598 = vmatprep.subr.mxu1 %v1547_v6 }
  0x65   : > { %687 = vmatprep.subr.mxu0 %v379_v25  ;;  %464 = vmatprep.mubr.f32.mxu1 %v1380_v0 }
  0x66   : > { %600 = vmatpush1.msra.mxu1 %v1549_v10  ;;  %691 = vmatpush1.msra.mxu0 %v385_v26 }
  0x67   : > { %466 = vmatmul.mubr.f32.gmra.mxu1 %v1611_v40  ;;  %602 = vmatprep.subr.mxu1 %v1551_v11 }
  0x68   : > { %695 = vmatprep.subr.mxu0 %v391_v29  ;;  %560 = vmatprep.mubr.f32.mxu0 %v1380_v0 }
  0x69   : > { %604 = vmatpush1.msra.mxu1 %v1553_v12  ;;  %699 = vmatpush1.msra.mxu0 %v397_v30 }
  0x6a   : > { %606 = vmatprep.subr.mxu1 %v1556_v16  ;;  %563 = vmatmul.mubr.f32.gmra.mxu0 %v1620_v47 }
  0x6b   : > { %703 = vmatprep.subr.mxu0 %v403_v31  ;;  %608 = vmatpush1.msra.mxu1 %v1561_v18 }
  0x6c   : > { %641 = vmatprep.mubr.f32.mxu1 %v1380_v0  ;;  %707 = vmatpush1.msra.mxu0 %v409_v36 }
  0x6d   : > { %645 = vmatmul.mubr.f32.vlgmr.msra.gmra.mxu1 %v333_v43  ;;  %711 = vmatprep.subr.mxu0 %v415_v55 }
  0x6e   : > { %788 = vmatprep.subr.mxu1 %v1543_v4  ;;  %715 = vmatpush1.msra.mxu0 %v421_v56 }
  0x6f   : > { %748 = vmatprep.mubr.f32.mxu0 %v1380_v0  ;;  %790 = vmatpush1.msra.mxu1 %v1545_v5 }
  0x70   : > { %750 = vmatmul.mubr.f32.vlgmr.msra.gmra.mxu0 %v1580_v27  ;;  %792 = vmatprep.subr.mxu1 %v1547_v6 }
  0x71   : > { %650 = vmatprep.mubr.f32.mxu1 %v1380_v0  ;;  %794 = vmatpush1.msra.mxu1 %v1549_v10 }
  0x72   : > { %755 = vmatprep.mubr.f32.mxu0 %v1380_v0  ;;  %654 = vmatmul.mubr.f32.gmra.mxu1 %v344_v52 }
  0x73   : > { %796 = vmatprep.subr.mxu1 %v1551_v11  ;;  %835 = vmatprep.mubr.f32.mxu1 %v1380_v0 }
  0x74   : > { %798 = vmatpush1.msra.mxu1 %v1553_v12  ;;  %757 = vmatmul.mubr.f32.gmra.mxu0 %v1611_v40 }
  0x75   : > { %800 = vmatprep.subr.mxu1 %v1556_v16  ;;  %v208_v16 = vlaneseq }
  0x76   : > { %802 = vmatpush1.msra.mxu1 %v1561_v18 }
  0x77   : > { %837 = vmatmul.mubr.f32.vlgmr.msra.gmra.mxu1 %v1580_v27  ;;  %v209_v21 = vand.u32 127, %v208_v16  ;;  %vm1039_vm12 = vcmp.lt.s32.totalorder %v208_v16, 256 }
  0x78   : > { %842 = vmatprep.mubr.f32.mxu1 %v1380_v0 }
  0x79   : > { %v210_v31 = vadd.s32 128, %v209_v21  ;;  %v215_v42 = vand.u32 15, %v209_v21 }
  0x7b   : > { %844 = vmatmul.mubr.f32.gmra.mxu1 %v1611_v40  ;;  %v222_v43 = vand.u32 15, %v210_v31  ;;  %vm239_vm1 = vcmp.lt.s32.totalorder %v215_v42, 15  ;;  %vm235_vm3 = vcmp.gt.s32.totalorder %v215_v42, 0 }
  0x7c   : > { %v241_v55 = vsel %vm239_vm1, 1.0, %v1380_v0  ;;  %v237_v57 = vsel %vm235_vm3, 1.0, %v1380_v0 }
  0x7d   : > { %vm240_vm2 = vcmp.lt.s32.totalorder %v222_v43, 15  ;;  %vm236_vm4 = vcmp.gt.s32.totalorder %v222_v43, 0 }
  0x7e   : > { %v242_v56 = vsel %vm240_vm2, 1.0, %v1380_v0  ;;  %v238_v58 = vsel %vm236_vm4, 1.0, %v1380_v0 }
  0x7f   : > { %v1228_v61 = vpack.i.bf16 %v242_v56, %v241_v55  ;;  %v1233_v62 = vpack.i.bf16 %v238_v58, %v237_v57 }
  0xc1   : > { %v881_v63 = vpop.permute.xlu1 %880 }
  0xcb   : > { %v859_v1 = vpop.permute.xlu0 %858 }
 0x11b   : > { %v337_v2 = vpop.f32.mrf.mxu0 }
 0x11d   : > { %v339_v3 = vpop.f32.mrf.mxu0 }
 0x11f   : > { %v348_v4 = vpop.f32.mrf.mxu0 }
 0x121   : > { %v350_v5 = vpop.f32.mrf.mxu0  ;;  %v460_v6 = vpop.f32.mrf.mxu1 }
 0x122   : > { %v461_v13 = vadd.f32 %v460_v6, %v337_v2 }
 0x123   : > { %v462_v7 = vpop.f32.mrf.mxu1 }
 0x124   : > { %v556_v8 = vpop.f32.mrf.mxu0  ;;  %v463_v17 = vadd.f32 %v462_v7, %v339_v3 }
 0x125   : > { %v557_v19 = vadd.f32 %v556_v8, %v461_v13 }
 0x126   : > { %v558_v10 = vpop.f32.mrf.mxu0 }
 0x127   : > { %v467_v9 = vpop.f32.mrf.mxu1  ;;  %v559_v23 = vadd.f32 %v558_v10, %v463_v17 }
 0x128   : > { %v468_v22 = vadd.f32 %v467_v9, %v348_v4 }
 0x129   : > { %v469_v11 = vpop.f32.mrf.mxu1 }
 0x12a   : > { %v564_v12 = vpop.f32.mrf.mxu0  ;;  %v470_v24 = vadd.f32 %v469_v11, %v350_v5 }
 0x12b   : > { %v565_v32 = vadd.f32 %v564_v12, %v468_v22 }
 0x12c   : > { %v566_v14 = vpop.f32.mrf.mxu0 }
 0x12d   : > { %v646_v15 = vpop.f32.mrf.mxu1  ;;  %v567_v33 = vadd.f32 %v566_v14, %v470_v24 }
 0x12e   : > { %v647_v25 = vadd.f32 %v646_v15, %v557_v19 }
 0x12f   : > { %v648_v18 = vpop.f32.mrf.mxu1 }
 0x130   : > { %v751_v20 = vpop.f32.mrf.mxu0  ;;  %v649_v28 = vadd.f32 %v648_v18, %v559_v23 }
 0x131   : > { %v752_v34 = vadd.f32 %v751_v20, %v647_v25 }
 0x132   : > { %v753_v26 = vpop.f32.mrf.mxu0  ;;  %v655_v27 = vpop.f32.mrf.mxu1 }
 0x133   : > { %v656_v36 = vadd.f32 %v655_v27, %v565_v32  ;;  %v754_v37 = vadd.f32 %v753_v26, %v649_v28 }
 0x134   : > { %v657_v29 = vpop.f32.mrf.mxu1  ;;  %v758_v30 = vpop.f32.mrf.mxu0 }
 0x135   : > { %v658_v38 = vadd.f32 %v657_v29, %v567_v33  ;;  %v759_v48 = vadd.f32 %v758_v30, %v656_v36 }
 0x136   : > { %v760_v40 = vpop.f32.mrf.mxu0 }
 0x137   : > { %v838_v35 = vpop.f32.mrf.mxu1  ;;  %v761_v49 = vadd.f32 %v760_v40, %v658_v38 }
 0x138   : > { %v839_v39 = vadd.f32 %v838_v35, %v752_v34 }
 0x139   : > { %v840_v41 = vpop.f32.mrf.mxu1 }
 0x13a   : > { %v1684_v44 = vadd.f32 %v840_v41, %v754_v37  ;;  %v873_v45 = vrot.slane %v839_v39, 6  ;;  %v856_v46 = vrot.slane %v839_v39, 3 }
 0x13b   : > { %v845_v47 = vpop.f32.mrf.mxu1 }
 0x13c   : > { %876 = vrot.lane.b32.xlu1 %v873_v45, %s1381_s19  ;;  %860 = vrot.lane.b32.xlu0 %v856_v46, %s1382_s21  ;;  %v846_v51 = vadd.f32 %v845_v47, %v759_v48  ;;  %v857_v53 = vrot.slane %v1684_v44, 3  ;;  %v874_v54 = vrot.slane %v1684_v44, 6 }
 0x13d   : > { %v847_v50 = vpop.f32.mrf.mxu1 }
 0x13e   : > { %v848_v52 = vadd.f32 %v847_v50, %v761_v49  ;;  %v899_v59 = vrot.slane %v846_v51, 6 }
 0x140   : > { %862 = vrot.lane.b32.xlu1 %v857_v53, %s1382_s21  ;;  %878 = vrot.lane.b32.xlu0 %v874_v54, %s1381_s19  ;;  %v900_v60 = vrot.slane %v848_v52, 6  ;;  %v983_v53 = vstv %s207_s29 }
 0x144   : > { %901 = vrot.lane.b32.xlu0 %v899_v59, %s1381_s19  ;;  %903 = vrot.lane.b32.xlu1 %v900_v60, %s1381_s19  ;;  %s1310_s19 = scalar_lea.vmem %s1309_s28, 64 }
 0x145   : > { %p1312_p2 = scmp.lt.s32.totalorder %s1310_s19, %s1304_s27 }
 0x147   : > { %p1313_p13 = por %p1312_p2, %p1311_p10 }
 0x148   : > { %1229 = vrot.lane.b32.xlu0 %v1228_v61, %s1383_s13  ;;  %1234 = vrot.lane.b32.xlu1 %v1233_v62, %s1384_s22 }
 0x149   : > { %p1314_p0 = pnand %p1313_p13, %p1307_p12 }
 0x1ae   : > { %v877_v2 = vpop.permute.xlu1 %876  ;;  %v861_v3 = vpop.permute.xlu0 %860 }
 0x1af   : > { %v865_v4 = vsel %vm864_vm5, %v859_v1, %v861_v3  ;;  %v893_v0 = vadd.f32 %v877_v2, %v861_v3 }
 0x1b0   : > { %v888_v5 = vadd.f32 %v877_v2, %v865_v4 }
 0x1b1   : > { %v930_v6 = vrot.slane %v893_v0, 1 }
 0x1b2   : > { %v863_v7 = vpop.permute.xlu1 %862  ;;  %v879_v8 = vpop.permute.xlu0 %878 }
 0x1b3   : > { %v866_v9 = vsel %vm864_vm5, %v861_v3, %v863_v7  ;;  %v872_v10 = vadd.f32 %v863_v7, %v1684_v44  ;;  %933 = vrot.lane.b32.xlu0 %v930_v6, %s1385_s23  ;;  %v884_v12 = vsel %vm882_vm6, %v879_v8, %v881_v63  ;;  %v883_v13 = vsel %vm882_vm6, %v877_v2, %v879_v8 }
 0x1b4   : > { %v871_v11 = vadd.f32 %v866_v9, %v839_v39  ;;  %v894_v20 = vsel %vm864_vm5, %v863_v7, %v859_v1 }
 0x1b5   : > { %v890_v14 = vadd.f32 %v884_v12, %v872_v10  ;;  %v896_v25 = vadd.f32 %v894_v20, %v1684_v44  ;;  %v1387_v10 = vmov 1966171168  }
 0x1b6   : > { %v889_v15 = vadd.f32 %v883_v13, %v871_v11  ;;  %v902_v17 = vpop.permute.xlu0 %901  ;;  %v904_v18 = vpop.permute.xlu1 %903  ;;  %v1013_v13 = vshrl.u32 %v208_v16, 7 }
 0x1b7   : > { %v932_v19 = vrot.slane %v890_v14, 1  ;;  %v905_v22 = vsel %vm882_vm6, %v902_v17, %v904_v18  ;;  %v906_v23 = vsel %vm882_vm6, %v904_v18, %v881_v63  ;;  %v910_v26 = vadd.f32 %v902_v17, %v861_v3 }
 0x1b8   : > { %v931_v21 = vrot.slane %v889_v15, 1  ;;  %v911_v29 = vadd.f32 %v905_v22, %v871_v11  ;;  %v912_v30 = vadd.f32 %v906_v23, %v896_v25  ;;  %v1010_v11 = vunpack.c.l.s4 %v1387_v10 }
 0x1b9   : > { %937 = vrot.lane.b32.xlu0 %v932_v19, %s1385_s23 }
 0x1ba   : > { %v1230_v24 = vpop.permute.xlu0 %1229  ;;  %935 = vrot.lane.b32.xlu1 %v931_v21, %s1385_s23  ;;  %v1235_v38 = vpop.permute.xlu1 %1234  ;;  %v1011_v12 = vunpack.c.0.s8 %v1010_v11 }
 0x1bb   : > { %v1232_v27 = vunpack.i.h.bf16 %v1230_v24  ;;  %v1231_v28 = vunpack.i.l.bf16 %v1230_v24  ;;  %v1237_v40 = vunpack.i.h.bf16 %v1235_v38  ;;  %v1236_v41 = vunpack.i.l.bf16 %v1235_v38 }
 0x1bc   : > { %v1014_v17 = vsub.s32 %v1011_v12, %v1013_v13 }
 0x1bd   : > { %v959_v31 = vmul.f32 %v1231_v28, %v910_v26  ;;  %v955_v32 = vsel %vm954_vm7, %v1231_v28, %v1232_v27  ;;  %v961_v34 = vmul.f32 %v1232_v27, %v912_v30  ;;  %v924_v45 = vmul.f32 %v1236_v41, %v888_v5 }
 0x1be   : > { %v960_v33 = vmul.f32 %v955_v32, %v911_v29  ;;  %v920_v46 = vsel %vm919_vm9, %v1236_v41, %v1237_v40  ;;  %v926_v48 = vmul.f32 %v1237_v40, %v890_v14 }
 0x1bf   : > { %v965_v35 = vrot.slane %v959_v31, 2  ;;  %v967_v37 = vrot.slane %v961_v34, 2  ;;  %v925_v52 = vmul.f32 %v920_v46, %v889_v15 }
 0x1c0   : > { %v966_v36 = vrot.slane %v960_v33, 2 }
 0x1c1   : > { %968 = vrot.lane.b32.xlu1 %v965_v35, %s1386_s24 }
 0x1c2   : > { %970 = vrot.lane.b32.xlu0 %v966_v36, %s1386_s24 }
 0x1c5   : > { %972 = vrot.lane.b32.xlu1 %v967_v37, %s1386_s24 }
 0x225   : > { %v934_v39 = vpop.permute.xlu0 %933 }
 0x22b   : > { %v938_v43 = vpop.permute.xlu0 %937 }
 0x22c   : > { %v936_v42 = vpop.permute.xlu1 %935  ;;  %v947_v55 = vadd.f32 %v938_v43, %v926_v48 }
 0x22d   : > { %v940_v44 = vsel %vm939_vm8, %v934_v39, %v936_v42  ;;  %v941_v49 = vsel %vm939_vm8, %v936_v42, %v938_v43 }
 0x22e   : > { %v945_v50 = vadd.f32 %v940_v44, %v924_v45  ;;  %v946_v57 = vadd.f32 %v941_v49, %v925_v52 }
 0x233   : > { %v969_v47 = vpop.permute.xlu1 %968 }
 0x234   : > { %v971_v51 = vpop.permute.xlu0 %970 }
 0x235   : > { %v975_v54 = vsel %vm974_vm10, %v969_v47, %v971_v51 }
 0x236   : > { %v980_v56 = vadd.f32 %v975_v54, %v945_v50 }
 0x237   : > { %v973_v58 = vpop.permute.xlu1 %972 }
 0x238   : > { %v984_v59 = vadd.f32 %v983_v53, %v980_v56  ;;  %v976_v60 = vsel %vm974_vm10, %v971_v51, %v973_v58  ;;  %v982_v61 = vadd.f32 %v973_v58, %v947_v55 }
 0x239   : > { %v981_v62 = vadd.f32 %v976_v60, %v946_v57 }
 0x23a   : > { %v1148_v63 = vmul.f32 -1.442695, %v984_v59  ;;  %v986_v1 = vadd.f32 %v983_v53, %v982_v61 }
 0x23b   : > { %v985_v2 = vadd.f32 %v983_v53, %v981_v62 }
 0x23c   : > { %1238 = vpow2.f32 %v1148_v63  ;;  %v1150_v3 = vmul.f32 -1.442695, %v986_v1 }
 0x23d   : > { %v1149_v4 = vmul.f32 -1.442695, %v985_v2 }
 0x23e   : > { %1240 = vpow2.f32 %v1150_v3 }
 0x23f   : > { %1242 = vpow2.f32 %v1149_v4 }
 0x249   : > { %v1239_v0 = vpop.eup %1238 }
 0x24a   : > { %v996_v5 = vadd.f32 1.0, %v1239_v0 }
 0x24b   : > { %v1241_v6 = vpop.eup %1240 }
 0x24c   : > { %v1243_v7 = vpop.eup %1242  ;;  %v998_v8 = vadd.f32 1.0, %v1241_v6  ;;  %1244 = vrcp.f32 %v996_v5 }
 0x24d   : > { %v997_v9 = vadd.f32 1.0, %v1243_v7 }
 0x24e   : > { %1246 = vrcp.f32 %v998_v8 }
 0x24f   : > { %1248 = vrcp.f32 %v997_v9 }
 0x259   : > { %v1245_v14 = vpop.eup %1244 }
 0x25b   : > { %v1247_v15 = vpop.eup %1246 }
 0x25c   : > { %v1249_v18 = vpop.eup %1248  ;;  %v1022_v21 = vrot.slane %v1247_v15, %v1014_v17 }
 0x25d   : > { %v1008_v19 = vcombine.low %v1245_v14, %v1249_v18 }
 0x25f   : > { %v1015_v20 = vrot.slane %v1008_v19, %v1014_v17 }
 0x261   : > { %v1023_v22 = vcombine.low %v1015_v20, %v1022_v21 }
 0x263   : > { %v1030_v23 = vrot.slane %v1023_v22, %v1014_v17 }
 0x265   : > { %1031 = vrot.lane.b32.xlu0 %v1030_v23, %s1388_s30 }
 0x2d7   : > { %v1032_v24 = vpop.permute.xlu0 %1031 }
 0x2d8   : > { %v1033_v25 = vrot.slane %v1032_v24, 1 }
 0x2da   : > { %v1035_v26 = vsel %vm1034_vm11, %v1032_v24, %v1033_v25 }
 0x2db   : > { %1041 = vst.msk [vmem:[%s204_s8] sm:$0x3] %vm1039_vm12, %v1035_v26 }
 0x2dc   : > { %1317 = shalt.err (!%p1314_p0)
}
 0x2dd   : > { %s1318_s21 = scalar_lea.hbm %s1714_s12, 32  ;;  %s1322_s22 = scalar_lea.hbm %s1754_s3, 64 }
 0x2de   : > { %p1319_p5 = scmp.ne.s32.totalorder %s1714_s12, %s1318_s21  ;;  %p1323_p4 = scmp.lt.s32.totalorder %s1714_s12, %s1754_s3 }
 0x2df   : > { %p1324_p6 = scmp.lt.s32.totalorder %s1322_s22, %s1318_s21 }
 0x2e0   : > { %p1320_p9 = pnand %p1319_p5, %p1770_p11 }
 0x2e1   : > { %p1325_p8 = por %p1324_p6, %p1323_p4 }
 0x2e2   : > { %p1321_p1 = pneg %p1320_p9 }
 0x2e4   : > { %p1326_p3 = pnand %p1325_p8, %p1321_p1 }
 0x2e6   : > { %1329 = shalt.err (!%p1326_p3)
}
 0x2e7   : > { %1164 = dma.vmem_to_hbm [thread:$0]  (%p1770_p11), %s1058_s9, 32, %s1714_s12, %s1043_s26  }
 0x2e8 PF: > { %s1069_s29 = sand.u32 1, %s1360_s14   ;;  %p1771_p7 = scmp.ne.s32.totalorder %s1760_s20, 0 }
 0x2e9   : > { %p1772_p12 = scmp.ge.s32.totalorder %s1372_s17, 2  ;;  %s1070_s30 = scalar_lea.sflag [#allocation5], %s1069_s29 }
 0x2eb   : > { %p1175_p10 = pnand %p1772_p12, %p1771_p7 }
 0x2ed   : > { %p1176_p2 = pneg %p1175_p10 }
 0x2ef   : > { %1355 = dma.done.wait (%p1176_p2), %s1070_s30, 32  }
 0x2f0   : > { %1357 = vsyncadd (%p1176_p2), %s1070_s30, 4294967264  ;;  %p18_p13 = scmp.ge.s32.totalorder %s1467_s25, 4   ;;  %s1773_s14 = smov %s1364_s15 }
 0x2f1   : > { %s1774_s15 = smov %s1368_s16  ;;  %s1775_s16 = smov %s1484_s6 }
 0x2f2   : > { %s1776_s17 = smov %s1467_s25  ;;  %20 = sbr.rel (!%p18_p13) target bundleno = 8 (0x8), region = 81 }
 0x2f7   :  { %1075 = vsyncpa [#allocation4], 1 }
 0x2f8   :  { %1077 = vsyncpa [#allocation4 + $0x1], 1 }
 0x2f9   :  { %1078 = vsyncpa [#allocation7], 1 }
 0x2fa   :  { %1079 = vsyncpa [#allocation5], 1 }
 0x2fb   :  { %1081 = vsyncpa [#allocation5 + $0x1], 1 }

</bundles_post_ra>
